<compile_context>
chip_gen: v7x
topology: tpu7x:2x2x1
jax: 0.10.0
libtpu: 0.0.40
codegen_flags: <defaults>
</compile_context>

<pallas_src>
import functools
import math

import jax
import jax.numpy as jnp
from jax import lax
from jax.experimental import pallas as pl
from jax.experimental.pallas import tpu as pltpu

DIM = 2
HIDDEN_DIMS = (16, 128, 256, 128, 16)

_dims = (DIM + 2,) + HIDDEN_DIMS
LAYER_SIZES = list(zip(_dims[:-1], _dims[1:])) + [(HIDDEN_DIMS[-1], DIM)]
N_LAYERS = len(LAYER_SIZES)  # 6

LANE = 128
IN_PAD = 128    # kernel input width  (layer-0 output: 16 -> 128, lane-dense)
OUT_PAD = 128   # kernel output width (final layer:    2 -> 128, lane-dense)

_INV_SQRT2 = 1.0 / math.sqrt(2.0)


def _round_up(n, m):
    return ((n + m - 1) // m) * m


# ---- kernel-side layer geometry (layers 1..5, zero-padded to lane-dense) ------
_k_shapes = []
for _li in range(1, N_LAYERS):
    _in_d, _out_d = LAYER_SIZES[_li]
    _k_shapes.append((max(LANE, _round_up(_in_d, LANE)),
                      max(LANE, _round_up(_out_d, LANE))))
_offs = []
_o = 0
for _pin, _pout in _k_shapes:
    _offs.append(_o)
    _o += _pin
W_BLOB_ROWS = _o                                    # 768
W_BLOB_COLS = max(p for _, p in _k_shapes)          # 256
B_BLOB_ROWS = 8                                     # sublane-aligned bias blob
# (row_offset_in_weight_blob, padded_in, padded_out) for each kernel layer
KLAYERS = tuple((off, pin, pout) for off, (pin, pout) in zip(_offs, _k_shapes))
N_KLAYERS = len(KLAYERS)

# Padded widths must chain: IN_PAD -> L1 -> ... -> L5 == OUT_PAD.
_chain = (IN_PAD,) + tuple(pout for _, _, pout in KLAYERS)
for (_koff, _kpin, _kpout), _prev in zip(KLAYERS, _chain[:-1]):
    assert _kpin == _prev, "padded layer widths must chain"
assert KLAYERS[-1][2] == OUT_PAD


def _mlp_kernel(h_ref, w_ref, b_ref, out_ref, *, act_dtype):
    """Layers 1..5 of the MLP on one (TB, IN_PAD) batch tile.

    h_ref  : (TB, IN_PAD)              bf16 -- GELU(layer0), lane-padded, pre-cast
    w_ref  : (W_BLOB_ROWS, W_BLOB_COLS) bf16 -- packed zero-padded weights (resident)
    b_ref  : (B_BLOB_ROWS, W_BLOB_COLS) f32  -- packed zero-padded biases   (resident)
    out_ref: (TB, OUT_PAD)             f32  -- lane-dense store
    """
    h = h_ref[...]                                          # (TB, 128) bf16
    for li, (off, in_d, out_d) in enumerate(KLAYERS):
        w = w_ref[off:off + in_d, 0:out_d]                  # (in_d, out_d) bf16
        acc = jnp.dot(h, w, preferred_element_type=jnp.float32)
        b = b_ref[li:li + 1, 0:out_d]                       # (1, out_d) f32
        if li != N_KLAYERS - 1:
            z = acc.astype(act_dtype) + b.astype(act_dtype)
            # tanh-approx GELU -> transcendental goes to the EUP slot.
            h = jax.nn.gelu(z, approximate=True).astype(jnp.bfloat16)
        else:
            out_ref[...] = acc + b                          # (TB, 128) f32


def _gelu_erf(x):
    # nn.GELU() default (exact erf) -- used only in the hoisted wrapper layer 0
    # and in the reference, where it is free / exact.
    return 0.5 * x * (1.0 + lax.erf(x * _INV_SQRT2))


def _activation_dtype():
    """bf16 activations on v6e/v7x (bf16 VPU/EUP); f32 on v5e and older."""
    try:
        kind = jax.devices()[0].device_kind.lower()
    except Exception:
        return jnp.float32
    if any(t in kind for t in ("v2", "v3", "v4", "v5")):
        return jnp.float32
    return jnp.bfloat16


def _choose_batch_tile(batch):
    if batch < 256:
        return max(8, _round_up(batch, 8))        # one small, 8-aligned tile
    # Largest 128-multiple tile that still leaves >= 2 grid steps (so the
    # "parallel" batch axis can shard across v7x's two TensorCores) while
    # amortizing the ~0.35us per-grid-step overhead at large batch.
    for tb in (2048, 1024, 512, 256, 128):
        if batch >= 2 * tb:
            return tb
    return 128


def _pack_kernel_params(params):
    """Pad layers 1..N-1 to lane-dense shapes and pack into two resident blobs."""
    w_rows, b_rows = [], []
    for li in range(1, N_LAYERS):
        in_d, out_d = LAYER_SIZES[li]
        pin = KLAYERS[li - 1][1]
        w, b = params[li]
        w = jnp.asarray(w, jnp.float32)
        b = jnp.asarray(b, jnp.float32).reshape(1, -1)
        w = jnp.pad(w, ((0, pin - in_d), (0, W_BLOB_COLS - out_d)))
        b = jnp.pad(b, ((0, 0), (0, W_BLOB_COLS - out_d)))
        w_rows.append(w)
        b_rows.append(b)
    w_blob = jnp.concatenate(w_rows, axis=0).astype(jnp.bfloat16)        # (768, 256)
    b_blob = jnp.concatenate(
        b_rows + [jnp.zeros((B_BLOB_ROWS - len(b_rows), W_BLOB_COLS), jnp.float32)],
        axis=0)                                                          # (8, 256)
    return w_blob, b_blob


def init_params(key):
    """Deterministic synthetic parameters: W stored as (in, out), b as (1, out)."""
    params = []
    for (in_d, out_d) in LAYER_SIZES:
        key, kw, kb = jax.random.split(key, 3)
        bound = 1.0 / math.sqrt(in_d)  # mimic nn.Linear's uniform init bound
        w = jax.random.uniform(kw, (in_d, out_d), jnp.float32, -bound, bound)
        b = jax.random.uniform(kb, (1, out_d), jnp.float32, -bound, bound)
        params.append((w, b))
    return params


@jax.jit
def time_input_mlp_forward(x, sigma, params):
    """x: (B, DIM) f32; sigma: scalar () or (B,) positive f32 -> (B, DIM) f32."""
    B = x.shape[0]
    x = x.astype(jnp.float32)

    # --- hoisted to the wrapper: sigma embedding + tiny layer 0 ----------------
    sigma = jnp.squeeze(jnp.asarray(sigma, jnp.float32))
    if sigma.ndim == 0:
        sigma = jnp.broadcast_to(sigma, (B,))
    half_log_sigma = 0.5 * jnp.log(sigma.reshape(B, 1))
    nn_input = jnp.concatenate(
        [x, jnp.sin(half_log_sigma), jnp.cos(half_log_sigma)], axis=1)   # (B, 4)

    w0, b0 = params[0]
    h0 = nn_input @ jnp.asarray(w0, jnp.float32) \
        + jnp.asarray(b0, jnp.float32).reshape(1, -1)
    h0 = _gelu_erf(h0)                                                   # (B, 16)
    h0 = jnp.pad(h0, ((0, 0), (0, IN_PAD - h0.shape[1]))).astype(jnp.bfloat16)

    TB = _choose_batch_tile(B)
    B_pad = _round_up(B, TB)
    if B_pad != B:
        h0 = jnp.pad(h0, ((0, B_pad - B), (0, 0)))
    n_tiles = B_pad // TB

    w_blob, b_blob = _pack_kernel_params(params)
    act_dtype = _activation_dtype()

    macs_per_row = sum(pin * pout for _, pin, pout in KLAYERS)
    cost = pl.CostEstimate(
        flops=2 * B_pad * macs_per_row,
        transcendentals=B_pad * sum(pout for _, _, pout in KLAYERS[:-1]),
        bytes_accessed=(B_pad * IN_PAD * 2 + B_pad * OUT_PAD * 4
                        + W_BLOB_ROWS * W_BLOB_COLS * 2
                        + B_BLOB_ROWS * W_BLOB_COLS * 4),
    )

    out_padded = pl.pallas_call(
        functools.partial(_mlp_kernel, act_dtype=act_dtype),
        out_shape=jax.ShapeDtypeStruct((B_pad, OUT_PAD), jnp.float32),
        grid=(n_tiles,),
        in_specs=[
            pl.BlockSpec((TB, IN_PAD), lambda i: (i, 0)),                 # batch tile
            pl.BlockSpec((W_BLOB_ROWS, W_BLOB_COLS), lambda i: (0, 0)),   # resident W
            pl.BlockSpec((B_BLOB_ROWS, W_BLOB_COLS), lambda i: (0, 0)),   # resident b
        ],
        out_specs=pl.BlockSpec((TB, OUT_PAD), lambda i: (i, 0)),
        compiler_params=pltpu.CompilerParams(
            dimension_semantics=("parallel",),
            vmem_limit_bytes=32 * 1024 * 1024,
        ),
        cost_estimate=cost,
    )(h0, w_blob, b_blob)

    return out_padded[:B, :DIM]


def reference_forward(x, sigma, params):
    """Pure-JAX f32 reference matching the PyTorch forward (exact erf GELU)."""
    B = x.shape[0]
    sigma = jnp.squeeze(jnp.asarray(sigma, jnp.float32))
    if sigma.ndim == 0:
        sigma = jnp.broadcast_to(sigma, (B,))
    s = sigma.reshape(B, 1)
    embeds = jnp.concatenate(
        [jnp.sin(jnp.log(s) / 2), jnp.cos(jnp.log(s) / 2)], axis=1)
    h = jnp.concatenate([x.astype(jnp.float32), embeds], axis=1)
    for li, (w, b) in enumerate(params):
        h = h @ jnp.asarray(w, jnp.float32) + jnp.asarray(b, jnp.float32).reshape(1, -1)
        if li != N_LAYERS - 1:
            h = _gelu_erf(h)
    return h


if __name__ == "__main__":
    key = jax.random.PRNGKey(0)
    k_param, k_x, k_sig, k_x2, k_sig2 = jax.random.split(key, 5)

    params = init_params(k_param)

    # Small batch (single-tile path), per-sample sigma vector.
    B = 8
    x = jax.random.normal(k_x, (B, DIM), dtype=jnp.float32)
    sigma = jnp.exp(jax.random.normal(k_sig, (B,), dtype=jnp.float32))  # positive

    out = jax.block_until_ready(time_input_mlp_forward(x, sigma, params))
    ref = reference_forward(x, sigma, params)
    assert out.shape == (B, DIM)
    # bf16 MXU matmuls + tanh-approx GELU vs. exact-erf f32 reference.
    assert jnp.allclose(out, ref, atol=3e-2, rtol=3e-2), "mismatch vs reference (B=8)"

    # Multi-tile grid + batch-padding path, scalar sigma broadcast.
    B2 = 260
    x2 = jax.random.normal(k_x2, (B2, DIM), dtype=jnp.float32)
    sigma2 = jnp.exp(jax.random.normal(k_sig2, (), dtype=jnp.float32))  # scalar, positive

    out2 = jax.block_until_ready(time_input_mlp_forward(x2, sigma2, params))
    ref2 = reference_forward(x2, sigma2, params)
    assert out2.shape == (B2, DIM)
    assert jnp.allclose(out2, ref2, atol=3e-2, rtol=3e-2), "mismatch vs reference (B=260)"

    print("KERNEL_OK")
</pallas_src>

<mosaic_0001>
module attributes {stable_mosaic.version = 11 : i64} {
  func.func @_mlp_kernel(%arg0: i32, %arg1: memref<8x128xbf16, #tpu.memory_space<vmem>>, %arg2: memref<768x256xbf16, #tpu.memory_space<vmem>>, %arg3: memref<8x256xf32, #tpu.memory_space<vmem>>, %arg4: memref<8x128xf32, #tpu.memory_space<vmem>>) attributes {dimension_semantics = [#tpu.dimension_semantics<parallel>], iteration_bounds = array<i64: 1>, scalar_prefetch = 0 : i64, scratch_operands = 0 : i64, tpu.core_type = #tpu.core_type<tc>, window_params = [{transform_indices = @transform_0, window_bounds = array<i64: 8, 128>}, {pipeline_mode = #tpu.pipeline_mode<synchronous>, transform_indices = @transform_1, window_bounds = array<i64: 768, 256>}, {pipeline_mode = #tpu.pipeline_mode<synchronous>, transform_indices = @transform_2, window_bounds = array<i64: 8, 256>}, {transform_indices = @transform_3, window_bounds = array<i64: 8, 128>}]} {
    %c0 = arith.constant 0 : index
    %c0_0 = arith.constant 0 : index
    %0 = vector.load %arg1[%c0, %c0_0] : memref<8x128xbf16, #tpu.memory_space<vmem>>, vector<8x128xbf16>
    %c0_1 = arith.constant 0 : index
    %c0_2 = arith.constant 0 : index
    %1 = vector.load %arg2[%c0_1, %c0_2] : memref<768x256xbf16, #tpu.memory_space<vmem>>, vector<128x128xbf16>
    %cst = arith.constant dense<0.000000e+00> : vector<8x128xf32>
    %2 = tpu.matmul %0, %1, %cst {dimension_numbers = #tpu.dot_dimension_numbers<[1], [0], [0], [1], [0, 0, 1, 1], [], []>} : vector<8x128xbf16>, vector<128x128xbf16>, vector<8x128xf32> -> vector<8x128xf32>
    %c0_3 = arith.constant 0 : index
    %c0_4 = arith.constant 0 : index
    %3 = vector.load %arg3[%c0_3, %c0_4] : memref<8x256xf32, #tpu.memory_space<vmem>>, vector<1x128xf32>
    %4 = arith.truncf %2 : vector<8x128xf32> to vector<8x128xbf16>
    %5 = arith.truncf %3 : vector<1x128xf32> to vector<1x128xbf16>
    %6 = vector.broadcast %5 : vector<1x128xbf16> to vector<8x128xbf16>
    %7 = arith.addf %4, %6 : vector<8x128xbf16>
    %8 = arith.mulf %7, %7 : vector<8x128xbf16>
    %9 = arith.mulf %7, %8 : vector<8x128xbf16>
    %cst_5 = arith.constant 4.467770e-02 : bf16
    %10 = vector.broadcast %cst_5 : bf16 to vector<8x128xbf16>
    %11 = arith.mulf %10, %9 : vector<8x128xbf16>
    %12 = arith.addf %7, %11 : vector<8x128xbf16>
    %cst_6 = arith.constant 7.968750e-01 : bf16
    %13 = vector.broadcast %cst_6 : bf16 to vector<8x128xbf16>
    %14 = arith.mulf %13, %12 : vector<8x128xbf16>
    %15 = math.tanh %14 : vector<8x128xbf16>
    %cst_7 = arith.constant 1.000000e+00 : bf16
    %16 = vector.broadcast %cst_7 : bf16 to vector<8x128xbf16>
    %17 = arith.addf %16, %15 : vector<8x128xbf16>
    %cst_8 = arith.constant 5.000000e-01 : bf16
    %18 = vector.broadcast %cst_8 : bf16 to vector<8x128xbf16>
    %19 = arith.mulf %18, %17 : vector<8x128xbf16>
    %20 = arith.mulf %7, %19 : vector<8x128xbf16>
    %c128 = arith.constant 128 : index
    %c0_9 = arith.constant 0 : index
    %21 = vector.load %arg2[%c128, %c0_9] : memref<768x256xbf16, #tpu.memory_space<vmem>>, vector<128x256xbf16>
    %cst_10 = arith.constant dense<0.000000e+00> : vector<8x256xf32>
    %22 = tpu.matmul %20, %21, %cst_10 {dimension_numbers = #tpu.dot_dimension_numbers<[1], [0], [0], [1], [0, 0, 1, 1], [], []>} : vector<8x128xbf16>, vector<128x256xbf16>, vector<8x256xf32> -> vector<8x256xf32>
    %c1 = arith.constant 1 : index
    %c0_11 = arith.constant 0 : index
    %23 = vector.load %arg3[%c1, %c0_11] : memref<8x256xf32, #tpu.memory_space<vmem>>, vector<1x256xf32>
    %24 = arith.truncf %22 : vector<8x256xf32> to vector<8x256xbf16>
    %25 = arith.truncf %23 : vector<1x256xf32> to vector<1x256xbf16>
    %26 = vector.broadcast %25 : vector<1x256xbf16> to vector<8x256xbf16>
    %27 = arith.addf %24, %26 : vector<8x256xbf16>
    %28 = arith.mulf %27, %27 : vector<8x256xbf16>
    %29 = arith.mulf %27, %28 : vector<8x256xbf16>
    %cst_12 = arith.constant 4.467770e-02 : bf16
    %30 = vector.broadcast %cst_12 : bf16 to vector<8x256xbf16>
    %31 = arith.mulf %30, %29 : vector<8x256xbf16>
    %32 = arith.addf %27, %31 : vector<8x256xbf16>
    %cst_13 = arith.constant 7.968750e-01 : bf16
    %33 = vector.broadcast %cst_13 : bf16 to vector<8x256xbf16>
    %34 = arith.mulf %33, %32 : vector<8x256xbf16>
    %35 = math.tanh %34 : vector<8x256xbf16>
    %cst_14 = arith.constant 1.000000e+00 : bf16
    %36 = vector.broadcast %cst_14 : bf16 to vector<8x256xbf16>
    %37 = arith.addf %36, %35 : vector<8x256xbf16>
    %cst_15 = arith.constant 5.000000e-01 : bf16
    %38 = vector.broadcast %cst_15 : bf16 to vector<8x256xbf16>
    %39 = arith.mulf %38, %37 : vector<8x256xbf16>
    %40 = arith.mulf %27, %39 : vector<8x256xbf16>
    %c256 = arith.constant 256 : index
    %c0_16 = arith.constant 0 : index
    %41 = vector.load %arg2[%c256, %c0_16] : memref<768x256xbf16, #tpu.memory_space<vmem>>, vector<256x128xbf16>
    %cst_17 = arith.constant dense<0.000000e+00> : vector<8x128xf32>
    %42 = tpu.matmul %40, %41, %cst_17 {dimension_numbers = #tpu.dot_dimension_numbers<[1], [0], [0], [1], [0, 0, 1, 1], [], []>} : vector<8x256xbf16>, vector<256x128xbf16>, vector<8x128xf32> -> vector<8x128xf32>
    %c2 = arith.constant 2 : index
    %c0_18 = arith.constant 0 : index
    %43 = vector.load %arg3[%c2, %c0_18] : memref<8x256xf32, #tpu.memory_space<vmem>>, vector<1x128xf32>
    %44 = arith.truncf %42 : vector<8x128xf32> to vector<8x128xbf16>
    %45 = arith.truncf %43 : vector<1x128xf32> to vector<1x128xbf16>
    %46 = vector.broadcast %45 : vector<1x128xbf16> to vector<8x128xbf16>
    %47 = arith.addf %44, %46 : vector<8x128xbf16>
    %48 = arith.mulf %47, %47 : vector<8x128xbf16>
    %49 = arith.mulf %47, %48 : vector<8x128xbf16>
    %cst_19 = arith.constant 4.467770e-02 : bf16
    %50 = vector.broadcast %cst_19 : bf16 to vector<8x128xbf16>
    %51 = arith.mulf %50, %49 : vector<8x128xbf16>
    %52 = arith.addf %47, %51 : vector<8x128xbf16>
    %cst_20 = arith.constant 7.968750e-01 : bf16
    %53 = vector.broadcast %cst_20 : bf16 to vector<8x128xbf16>
    %54 = arith.mulf %53, %52 : vector<8x128xbf16>
    %55 = math.tanh %54 : vector<8x128xbf16>
    %cst_21 = arith.constant 1.000000e+00 : bf16
    %56 = vector.broadcast %cst_21 : bf16 to vector<8x128xbf16>
    %57 = arith.addf %56, %55 : vector<8x128xbf16>
    %cst_22 = arith.constant 5.000000e-01 : bf16
    %58 = vector.broadcast %cst_22 : bf16 to vector<8x128xbf16>
    %59 = arith.mulf %58, %57 : vector<8x128xbf16>
    %60 = arith.mulf %47, %59 : vector<8x128xbf16>
    %c512 = arith.constant 512 : index
    %c0_23 = arith.constant 0 : index
    %61 = vector.load %arg2[%c512, %c0_23] : memref<768x256xbf16, #tpu.memory_space<vmem>>, vector<128x128xbf16>
    %cst_24 = arith.constant dense<0.000000e+00> : vector<8x128xf32>
    %62 = tpu.matmul %60, %61, %cst_24 {dimension_numbers = #tpu.dot_dimension_numbers<[1], [0], [0], [1], [0, 0, 1, 1], [], []>} : vector<8x128xbf16>, vector<128x128xbf16>, vector<8x128xf32> -> vector<8x128xf32>
    %c3 = arith.constant 3 : index
    %c0_25 = arith.constant 0 : index
    %63 = vector.load %arg3[%c3, %c0_25] : memref<8x256xf32, #tpu.memory_space<vmem>>, vector<1x128xf32>
    %64 = arith.truncf %62 : vector<8x128xf32> to vector<8x128xbf16>
    %65 = arith.truncf %63 : vector<1x128xf32> to vector<1x128xbf16>
    %66 = vector.broadcast %65 : vector<1x128xbf16> to vector<8x128xbf16>
    %67 = arith.addf %64, %66 : vector<8x128xbf16>
    %68 = arith.mulf %67, %67 : vector<8x128xbf16>
    %69 = arith.mulf %67, %68 : vector<8x128xbf16>
    %cst_26 = arith.constant 4.467770e-02 : bf16
    %70 = vector.broadcast %cst_26 : bf16 to vector<8x128xbf16>
    %71 = arith.mulf %70, %69 : vector<8x128xbf16>
    %72 = arith.addf %67, %71 : vector<8x128xbf16>
    %cst_27 = arith.constant 7.968750e-01 : bf16
    %73 = vector.broadcast %cst_27 : bf16 to vector<8x128xbf16>
    %74 = arith.mulf %73, %72 : vector<8x128xbf16>
    %75 = math.tanh %74 : vector<8x128xbf16>
    %cst_28 = arith.constant 1.000000e+00 : bf16
    %76 = vector.broadcast %cst_28 : bf16 to vector<8x128xbf16>
    %77 = arith.addf %76, %75 : vector<8x128xbf16>
    %cst_29 = arith.constant 5.000000e-01 : bf16
    %78 = vector.broadcast %cst_29 : bf16 to vector<8x128xbf16>
    %79 = arith.mulf %78, %77 : vector<8x128xbf16>
    %80 = arith.mulf %67, %79 : vector<8x128xbf16>
    %c640 = arith.constant 640 : index
    %c0_30 = arith.constant 0 : index
    %81 = vector.load %arg2[%c640, %c0_30] : memref<768x256xbf16, #tpu.memory_space<vmem>>, vector<128x128xbf16>
    %cst_31 = arith.constant dense<0.000000e+00> : vector<8x128xf32>
    %82 = tpu.matmul %80, %81, %cst_31 {dimension_numbers = #tpu.dot_dimension_numbers<[1], [0], [0], [1], [0, 0, 1, 1], [], []>} : vector<8x128xbf16>, vector<128x128xbf16>, vector<8x128xf32> -> vector<8x128xf32>
    %c4 = arith.constant 4 : index
    %c0_32 = arith.constant 0 : index
    %83 = vector.load %arg3[%c4, %c0_32] : memref<8x256xf32, #tpu.memory_space<vmem>>, vector<1x128xf32>
    %84 = vector.broadcast %83 : vector<1x128xf32> to vector<8x128xf32>
    %85 = arith.addf %82, %84 : vector<8x128xf32>
    %c0_33 = arith.constant 0 : index
    %c0_34 = arith.constant 0 : index
    %86 = vector.load %arg4[%c0_33, %c0_34] : memref<8x128xf32, #tpu.memory_space<vmem>>, vector<8x128xf32>
    tpu.vector_store %arg4[%c0_33, %c0_34], %85 {strides = array<i32>} : memref<8x128xf32, #tpu.memory_space<vmem>>, vector<8x128xf32>,
    return
  }
  func.func @transform_0(%arg0: i32) -> (i32, i32) {
    %c0_i32 = arith.constant 0 : i32
    %c0_i32_0 = arith.constant 0 : i32
    return %arg0, %c0_i32 : i32, i32
  }
  func.func @transform_1(%arg0: i32) -> (i32, i32) {
    %c0_i32 = arith.constant 0 : i32
    %c0_i32_0 = arith.constant 0 : i32
    %c0_i32_1 = arith.constant 0 : i32
    return %c0_i32, %c0_i32_0 : i32, i32
  }
  func.func @transform_2(%arg0: i32) -> (i32, i32) {
    %c0_i32 = arith.constant 0 : i32
    %c0_i32_0 = arith.constant 0 : i32
    %c0_i32_1 = arith.constant 0 : i32
    return %c0_i32, %c0_i32_0 : i32, i32
  }
  func.func @transform_3(%arg0: i32) -> (i32, i32) {
    %c0_i32 = arith.constant 0 : i32
    %c0_i32_0 = arith.constant 0 : i32
    return %arg0, %c0_i32 : i32, i32
  }
}

</mosaic_0001>

<bundles_post_ra>
// kernel: time_input_mlp_forward.1
= control target key start
LH: loop header
LB: loop body
LE: loop exit
PB: predicated region body
PF: predicated region fallthrough
CT: control target
= control target key end

     0   :  { %v976_v0 = vmov 0.0   ;;  %vm977_vm0 = vmmov 0   ;;  %v978_v19 = vmov 0   ;;  %v279_v60 = vlaneseq  ;;  %s1218_s1 = inlined_call_operand.vmem [shape: bf16[768,256], index: 1, kind: input, shape index: {}]   ;;  %s1219_s0 = inlined_call_operand.vmem [shape: bf16[8,128], index: 0, kind: input, shape index: {}]   ;;  %s1220_s2 = inlined_call_operand.vmem [shape: f32[8,256], index: 2, kind: input, shape index: {}]   ;;  %s1221_s3 = inlined_call_operand.vmem [shape: f32[8,128], index: 3, kind: output, shape index: {}]  }
   0x1   :  { %839 = vmatprep.subr.bf16.mxu0 %v976_v0  ;;  %v902_v1 = vld [vmem:[%s1218_s1] ss:$8 sps:$4 sm:$0xff]   ;;  %855 = vmatprep.mubr.msk.bf16.mxu0 %vm977_vm0, %v976_v0  ;;  %v903_v2 = vld [vmem:[%s1218_s1 + $0x10] ss:$8 sps:$4 sm:$0xff]   ;;  %v910_v10 = vld [vmem:[%s1218_s1 + $0x84] ss:$8 sps:$4 sm:$0xff]  }
   0x2   :  { %840 = vmatpush3.bf16.msra.mxu0 %v902_v1  ;;  %v904_v3 = vld [vmem:[%s1218_s1 + $0x20] ss:$8 sps:$4 sm:$0xff]   ;;  %v905_v4 = vld [vmem:[%s1218_s1 + $0x30] ss:$8 sps:$4 sm:$0xff]   ;;  %233 = vmatprep.subr.bf16.mxu1 %v910_v10  ;;  %v913_v12 = vld [vmem:[%s1218_s1 + $0x94] ss:$8 sps:$4 sm:$0xff]  }
   0x3   :  { %841 = vmatprep.subr.bf16.mxu0 %v976_v0  ;;  %v906_v5 = vld [vmem:[%s1218_s1 + $0x40] ss:$8 sps:$4 sm:$0xff]   ;;  %v907_v6 = vld [vmem:[%s1218_s1 + $0x50] ss:$8 sps:$4 sm:$0xff]   ;;  %v916_v14 = vld [vmem:[%s1218_s1 + $0xa4] ss:$8 sps:$4 sm:$0xff]   ;;  %265 = vmatprep.mubr.bf16.mxu1 %v978_v19 }
   0x4   :  { %v908_v7 = vld [vmem:[%s1218_s1 + $0x60] ss:$8 sps:$4 sm:$0xff]   ;;  %v909_v8 = vld [vmem:[%s1218_s1 + $0x70] ss:$8 sps:$4 sm:$0xff]   ;;  %v919_v16 = vld [vmem:[%s1218_s1 + $0xb4] ss:$8 sps:$4 sm:$0xff]  }
   0x5   :  { %v19_v9 = vld [vmem:[%s1219_s0] sm:$0xf]  ;;  %v915_v13 = vld [vmem:[%s1218_s1 + $0x90] ss:$8 sps:$4 sm:$0xff]   ;;  %v922_v18 = vld [vmem:[%s1218_s1 + $0xc4] ss:$8 sps:$4 sm:$0xff]  }
   0x6   :  { %842 = vmatpush3.bf16.msra.mxu0 %v903_v2  ;;  %v912_v11 = vld [vmem:[%s1218_s1 + $0x80] ss:$8 sps:$4 sm:$0xff]   ;;  %v921_v17 = vld [vmem:[%s1218_s1 + $0xb0] ss:$8 sps:$4 sm:$0xff]   ;;  %v925_v21 = vld [vmem:[%s1218_s1 + $0xd4] ss:$8 sps:$4 sm:$0xff]  }
   0x7   :  { %843 = vmatprep.subr.bf16.mxu0 %v976_v0  ;;  %234 = vmatpush1.bf16.msra.mxu1 %v912_v11  ;;  %v918_v15 = vld [vmem:[%s1218_s1 + $0xa0] ss:$8 sps:$4 sm:$0xff]   ;;  %v927_v22 = vld [vmem:[%s1218_s1 + $0xd0] ss:$8 sps:$4 sm:$0xff]   ;;  %v928_v23 = vld [vmem:[%s1218_s1 + $0xe4] ss:$8 sps:$4 sm:$0xff]  }
   0x8   :  { %235 = vmatprep.subr.bf16.mxu1 %v913_v12  ;;  %v924_v20 = vld [vmem:[%s1218_s1 + $0xc0] ss:$8 sps:$4 sm:$0xff]   ;;  %v931_v25 = vld [vmem:[%s1218_s1 + $0xf4] ss:$8 sps:$4 sm:$0xff]   ;;  %v933_v26 = vld [vmem:[%s1218_s1 + $0xf0] ss:$8 sps:$4 sm:$0xff]  }
   0x9   :  { %v930_v24 = vld [vmem:[%s1218_s1 + $0xe0] ss:$8 sps:$4 sm:$0xff]   ;;  %v936_v46 = vld [vmem:[%s1218_s1 + $0x190] ss:$8 sps:$4 sm:$0xff]   ;;  %v280_v61 = vshrl.u32 %v279_v60, 7 }
   0xa   :  { %844 = vmatpush3.bf16.msra.mxu0 %v904_v3  ;;  %v124_v27 = vld [vmem:[%s1220_s2] ss:$0 sm:$0xff]  ;;  %v937_v47 = vld [vmem:[%s1218_s1 + $0x110] ss:$8 sps:$4 sm:$0xff]  }
   0xb   :  { %845 = vmatprep.subr.bf16.mxu0 %v976_v0  ;;  %236 = vmatpush1.bf16.msra.mxu1 %v915_v13  ;;  %v126_v28 = vpack.c.bf16 %v124_v27, %v124_v27  ;;  %v934_v44 = vld [vmem:[%s1218_s1 + $0x180] ss:$8 sps:$4 sm:$0xff]   ;;  %v940_v50 = vld [vmem:[%s1218_s1 + $0x1b0] ss:$8 sps:$4 sm:$0xff]   ;;  %v281_v62 = vsub.s32 0, %v280_v61  ;;  %v285_v1 = vsub.s32 1, %v280_v61 }
   0xc   :  { %237 = vmatprep.subr.bf16.mxu1 %v916_v14  ;;  %v935_v45 = vld [vmem:[%s1218_s1 + $0x100] ss:$8 sps:$4 sm:$0xff]   ;;  %v941_v51 = vld [vmem:[%s1218_s1 + $0x130] ss:$8 sps:$4 sm:$0xff]  }
   0xd   :  { %v938_v48 = vld [vmem:[%s1218_s1 + $0x1a0] ss:$8 sps:$4 sm:$0xff]   ;;  %v944_v54 = vld [vmem:[%s1218_s1 + $0x1d0] ss:$8 sps:$4 sm:$0xff]  }
   0xe   :  { %846 = vmatpush3.bf16.msra.mxu0 %v905_v4  ;;  %v939_v49 = vld [vmem:[%s1218_s1 + $0x120] ss:$8 sps:$4 sm:$0xff]   ;;  %v945_v55 = vld [vmem:[%s1218_s1 + $0x150] ss:$8 sps:$4 sm:$0xff]  }
   0xf   :  { %847 = vmatprep.subr.bf16.mxu0 %v976_v0  ;;  %238 = vmatpush1.bf16.msra.mxu1 %v918_v15  ;;  %v942_v52 = vld [vmem:[%s1218_s1 + $0x1c0] ss:$8 sps:$4 sm:$0xff]   ;;  %v948_v58 = vld [vmem:[%s1218_s1 + $0x1f0] ss:$8 sps:$4 sm:$0xff]  }
  0x10   :  { %239 = vmatprep.subr.bf16.mxu1 %v919_v16  ;;  %v943_v53 = vld [vmem:[%s1218_s1 + $0x140] ss:$8 sps:$4 sm:$0xff]   ;;  %v949_v59 = vld [vmem:[%s1218_s1 + $0x170] ss:$8 sps:$4 sm:$0xff]  }
  0x11   :  { %v946_v56 = vld [vmem:[%s1218_s1 + $0x1e0] ss:$8 sps:$4 sm:$0xff]  }
  0x12   :  { %848 = vmatpush3.bf16.msra.mxu0 %v906_v5  ;;  %v947_v57 = vld [vmem:[%s1218_s1 + $0x160] ss:$8 sps:$4 sm:$0xff]  }
  0x13   :  { %849 = vmatprep.subr.bf16.mxu0 %v976_v0  ;;  %240 = vmatpush1.bf16.msra.mxu1 %v921_v17  ;;  %v757_v63 = vld [vmem:[%s1220_s2 + $0x1] ss:$8 sm:$0x3] }
  0x14   :  { %241 = vmatprep.subr.bf16.mxu1 %v922_v18  ;;  %v282_v2 = vrot.slane %v757_v63, %v281_v62  ;;  %v286_v3 = vrot.slane %v757_v63, %v285_v1  ;;  %v959_v63 = vld [vmem:[%s1218_s1 + $0x290] ss:$8 sps:$4 sm:$0xff]   ;;  %v960_v1 = vld [vmem:[%s1218_s1 + $0x2a0] ss:$8 sps:$4 sm:$0xff]  }
  0x16   :  { %850 = vmatpush3.bf16.msra.mxu0 %v907_v6  ;;  %v289_v4 = vpack.c.bf16 %v282_v2, %v282_v2  ;;  %v290_v5 = vpack.c.bf16 %v286_v3, %v286_v3  ;;  %v961_v2 = vld [vmem:[%s1218_s1 + $0x2b0] ss:$8 sps:$4 sm:$0xff]   ;;  %v962_v3 = vld [vmem:[%s1218_s1 + $0x2c0] ss:$8 sps:$4 sm:$0xff]  }
  0x17   :  { %851 = vmatprep.subr.bf16.mxu0 %v976_v0  ;;  %242 = vmatpush1.bf16.msra.mxu1 %v924_v20 }
  0x18   :  { %243 = vmatprep.subr.bf16.mxu1 %v925_v21  ;;  %v292_v6 = vpack.i.b16 %v289_v4, %v289_v4  ;;  %v963_v4 = vld [vmem:[%s1218_s1 + $0x2d0] ss:$8 sps:$4 sm:$0xff]  }
  0x1a   :  { %852 = vmatpush3.bf16.msra.mxu0 %v908_v7  ;;  %v299_v7 = vpack.i.b16 %v290_v5, %v290_v5  ;;  %v964_v5 = vld [vmem:[%s1218_s1 + $0x2e0] ss:$8 sps:$4 sm:$0xff]  }
  0x1b   :  { %853 = vmatprep.subr.bf16.mxu0 %v976_v0  ;;  %244 = vmatpush1.bf16.msra.mxu1 %v927_v22 }
  0x1c   :  { %245 = vmatprep.subr.bf16.mxu1 %v928_v23  ;;  %v304_v10 = vrot.slane %v299_v7, %v281_v62  ;;  %v610_v7 = vld [vmem:[%s1220_s2 + $0x3] ss:$0 sm:$0xff] }
  0x1e   :  { %854 = vmatpush3.bf16.msra.mxu0 %v909_v8  ;;  %v297_v8 = vrot.slane %v292_v6, %v281_v62  ;;  %v958_v62 = vld [vmem:[%s1218_s1 + $0x280] ss:$8 sps:$4 sm:$0xff]   ;;  %v965_v6 = vld [vmem:[%s1218_s1 + $0x2f0] ss:$8 sps:$4 sm:$0xff]  }
  0x1f   :  { %246 = vmatpush1.bf16.msra.mxu1 %v930_v24  ;;  %799 = vmatprep.subr.bf16.mxu0 %v934_v44  ;;  %v493_v44 = vld [vmem:[%s1220_s2 + $0x2] ss:$0 sm:$0xff] }
  0x20   :  { %247 = vmatprep.subr.bf16.mxu1 %v931_v25 }
  0x21   :  { %856 = vmatmul.mubr.bf16.vlgmr.msra.gmra.mrb[0].mxu0 %v19_v9 }
  0x22   :  { %800 = vmatpush3.bf16.msra.mxu0 %v935_v45 }
  0x23   :  { %248 = vmatpush1.bf16.msra.mxu1 %v933_v26  ;;  %801 = vmatprep.subr.bf16.mxu0 %v936_v46 }
  0x24   :  { %859 = vmatprep.subr.bf16.mxu1 %v976_v0 }
  0x26   :  { %802 = vmatpush3.bf16.msra.mxu0 %v937_v47 }
  0x27   :  { %803 = vmatprep.subr.bf16.mxu0 %v938_v48  ;;  %v495_v48 = vpack.c.bf16 %v493_v44, %v493_v44 }
  0x2a   :  { %804 = vmatpush3.bf16.msra.mxu0 %v939_v49 }
  0x2b   :  { %805 = vmatprep.subr.bf16.mxu0 %v940_v50 }
  0x2e   :  { %806 = vmatpush3.bf16.msra.mxu0 %v941_v51 }
  0x2f   :  { %807 = vmatprep.subr.bf16.mxu0 %v942_v52 }
  0x32   :  { %808 = vmatpush3.bf16.msra.mxu0 %v943_v53 }
  0x33   :  { %809 = vmatprep.subr.bf16.mxu0 %v944_v54 }
  0x36   :  { %810 = vmatpush3.bf16.msra.mxu0 %v945_v55 }
  0x37   :  { %811 = vmatprep.subr.bf16.mxu0 %v946_v56 }
  0x3a   :  { %812 = vmatpush3.bf16.msra.mxu0 %v947_v57 }
  0x3b   :  { %813 = vmatprep.subr.bf16.mxu0 %v948_v58 }
  0x3e   :  { %814 = vmatpush3.bf16.msra.mxu0 %v949_v59 }
  0x3f   :  { %879 = vmatprep.subr.bf16.mxu0 %v976_v0 }
  0xf4   :  { %v118_v29 = vpop.f32.mrb[0].mxu0 }
  0xf5   :  { %v125_v30 = vpack.c.bf16 %v118_v29, %v118_v29  ;;  %v857_v31 = vpop.f32.mrb[1].mxu0 }
  0xf6   :  { %v121_v32 = vpop.f32.mrb[2].mxu0 }
  0xf7   :  { %v127_v33 = vadd.bf16 %v126_v28, %v125_v30  ;;  %v858_v34 = vpop.f32.mrb[3].mxu0 }
  0xf9   :  { %v128_v35 = vmul.bf16 %v127_v33, %v127_v33 }
  0xfb   :  { %v129_v36 = vmul.bf16 %v128_v35, %v127_v33 }
  0xfd   :  { %v130_v37 = vmul.bf16 1027030327, %v129_v36  ;;  %v950_v36 = vld [vmem:[%s1218_s1 + $0x200] ss:$8 sps:$4 sm:$0xff]  }
  0xff   :  { %v131_v38 = vadd.bf16 %v130_v37, %v127_v33  ;;  %v951_v37 = vld [vmem:[%s1218_s1 + $0x210] ss:$8 sps:$4 sm:$0xff]  }
 0x101   :  { %v132_v39 = vmul.bf16 1061961548, %v131_v38  ;;  %v952_v38 = vld [vmem:[%s1218_s1 + $0x220] ss:$8 sps:$4 sm:$0xff]  }
 0x103   :  { %966 = vtanh.bf16 %v132_v39  ;;  %v953_v39 = vld [vmem:[%s1218_s1 + $0x230] ss:$8 sps:$4 sm:$0xff]  }
 0x10e   :  { %v967_v40 = vpop.eup %966 }
 0x10f   :  { %v134_v41 = vadd.bf16 1065369472, %v967_v40  ;;  %v954_v40 = vld [vmem:[%s1218_s1 + $0x240] ss:$8 sps:$4 sm:$0xff]  }
 0x111   :  { %v135_v42 = vmul.bf16 1056980736, %v134_v41  ;;  %v955_v41 = vld [vmem:[%s1218_s1 + $0x250] ss:$8 sps:$4 sm:$0xff]  }
 0x113   :  { %v136_v43 = vmul.bf16 %v135_v42, %v127_v33  ;;  %v956_v42 = vld [vmem:[%s1218_s1 + $0x260] ss:$8 sps:$4 sm:$0xff]  }
 0x115   :  { %266 = vmatmul.mubr.bf16.vlgmr.msra.gmra.mrb[0].mxu1 %v136_v43  ;;  %v957_v43 = vld [vmem:[%s1218_s1 + $0x270] ss:$8 sps:$4 sm:$0xff]  }
 0x116   :  { %875 = vmatprep.mubr.msk.bf16.mxu1 %vm977_vm0, %v976_v0  ;;  %860 = vmatpush3.bf16.msra.mxu1 %v950_v36 }
 0x117   :  { %861 = vmatprep.subr.bf16.mxu1 %v976_v0 }
 0x11a   :  { %862 = vmatpush3.bf16.msra.mxu1 %v951_v37 }
 0x11b   :  { %863 = vmatprep.subr.bf16.mxu1 %v976_v0 }
 0x11e   :  { %864 = vmatpush3.bf16.msra.mxu1 %v952_v38 }
 0x11f   :  { %865 = vmatprep.subr.bf16.mxu1 %v976_v0 }
 0x122   :  { %866 = vmatpush3.bf16.msra.mxu1 %v953_v39 }
 0x123   :  { %867 = vmatprep.subr.bf16.mxu1 %v976_v0 }
 0x126   :  { %868 = vmatpush3.bf16.msra.mxu1 %v954_v40 }
 0x127   :  { %869 = vmatprep.subr.bf16.mxu1 %v976_v0 }
 0x12a   :  { %870 = vmatpush3.bf16.msra.mxu1 %v955_v41 }
 0x12b   :  { %871 = vmatprep.subr.bf16.mxu1 %v976_v0 }
 0x12e   :  { %872 = vmatpush3.bf16.msra.mxu1 %v956_v42 }
 0x12f   :  { %873 = vmatprep.subr.bf16.mxu1 %v976_v0 }
 0x132   :  { %874 = vmatpush3.bf16.msra.mxu1 %v957_v43 }
 0x1e8   :  { %v267_v9 = vpop.f32.mrb[0].mxu1 }
 0x1e9   :  { %v276_v11 = vpack.c.bf16 %v267_v9, %v267_v9  ;;  %v269_v12 = vpop.f32.mrb[1].mxu1 }
 0x1ea   :  { %v277_v13 = vpack.c.bf16 %v269_v12, %v269_v12  ;;  %v271_v14 = vpop.f32.mrb[2].mxu1 }
 0x1eb   :  { %v305_v15 = vadd.bf16 %v297_v8, %v276_v11  ;;  %v272_v16 = vpop.f32.mrb[3].mxu1  ;;  %v612_v8 = vpack.c.bf16 %v610_v7, %v610_v7 }
 0x1ec   :  { %v306_v17 = vadd.bf16 %v304_v10, %v277_v13 }
 0x1ed   :  { %v307_v18 = vmul.bf16 %v305_v15, %v305_v15 }
 0x1ee   :  { %v308_v19 = vmul.bf16 %v306_v17, %v306_v17 }
 0x1ef   :  { %v309_v20 = vmul.bf16 %v307_v18, %v305_v15 }
 0x1f0   :  { %v310_v21 = vmul.bf16 %v308_v19, %v306_v17 }
 0x1f1   :  { %v311_v22 = vmul.bf16 1027030327, %v309_v20 }
 0x1f2   :  { %v312_v23 = vmul.bf16 1027030327, %v310_v21 }
 0x1f3   :  { %v313_v24 = vadd.bf16 %v311_v22, %v305_v15 }
 0x1f4   :  { %v314_v25 = vadd.bf16 %v312_v23, %v306_v17  ;;  %v639_v23 = vld [vmem:[%s1220_s2 + $0x4] ss:$0 sm:$0xff] }
 0x1f5   :  { %v315_v26 = vmul.bf16 1061961548, %v313_v24 }
 0x1f6   :  { %v316_v27 = vmul.bf16 1061961548, %v314_v25 }
 0x1f7   :  { %968 = vtanh.bf16 %v315_v26 }
 0x1f8   :  { %970 = vtanh.bf16 %v316_v27 }
 0x202   :  { %v969_v28 = vpop.eup %968 }
 0x203   :  { %v971_v29 = vpop.eup %970  ;;  %v319_v30 = vadd.bf16 1065369472, %v969_v28 }
 0x204   :  { %v320_v31 = vadd.bf16 1065369472, %v971_v29 }
 0x205   :  { %v321_v32 = vmul.bf16 1056980736, %v319_v30 }
 0x206   :  { %v322_v33 = vmul.bf16 1056980736, %v320_v31 }
 0x207   :  { %v323_v35 = vmul.bf16 %v321_v32, %v305_v15 }
 0x208   :  { %v324_v34 = vmul.bf16 %v322_v33, %v306_v17 }
 0x20a   :  { %485 = vmatprep.mubr.bf16.mxu0 %v324_v34 }
 0x20b   :  { %486 = vmatmul.mubr.bf16.vlgmr.msra.gmra.mrb[4].mxu0 %v323_v35 }
 0x20c   :  { %895 = vmatprep.mubr.msk.bf16.mxu0 %vm977_vm0, %v976_v0  ;;  %880 = vmatpush3.bf16.msra.mxu0 %v958_v62 }
 0x20d   :  { %881 = vmatprep.subr.bf16.mxu0 %v976_v0 }
 0x210   :  { %882 = vmatpush3.bf16.msra.mxu0 %v959_v63 }
 0x211   :  { %883 = vmatprep.subr.bf16.mxu0 %v976_v0 }
 0x214   :  { %884 = vmatpush3.bf16.msra.mxu0 %v960_v1 }
 0x215   :  { %885 = vmatprep.subr.bf16.mxu0 %v976_v0 }
 0x218   :  { %886 = vmatpush3.bf16.msra.mxu0 %v961_v2 }
 0x219   :  { %887 = vmatprep.subr.bf16.mxu0 %v976_v0 }
 0x21c   :  { %888 = vmatpush3.bf16.msra.mxu0 %v962_v3 }
 0x21d   :  { %889 = vmatprep.subr.bf16.mxu0 %v976_v0 }
 0x220   :  { %890 = vmatpush3.bf16.msra.mxu0 %v963_v4 }
 0x221   :  { %891 = vmatprep.subr.bf16.mxu0 %v976_v0 }
 0x224   :  { %892 = vmatpush3.bf16.msra.mxu0 %v964_v5 }
 0x225   :  { %893 = vmatprep.subr.bf16.mxu0 %v976_v0 }
 0x228   :  { %894 = vmatpush3.bf16.msra.mxu0 %v965_v6 }
 0x2de   :  { %v815_v45 = vpop.f32.mrb[4].mxu0 }
 0x2df   :  { %v816_v46 = vpop.f32.mrb[5].mxu0 }
 0x2e0   :  { %v817_v47 = vadd.f32 %v816_v46, %v815_v45  ;;  %v818_v49 = vpop.f32.mrb[6].mxu0 }
 0x2e1   :  { %v819_v50 = vpop.f32.mrb[7].mxu0 }
 0x2e2   :  { %v494_v51 = vpack.c.bf16 %v817_v47, %v817_v47 }
 0x2e4   :  { %v496_v52 = vadd.bf16 %v495_v48, %v494_v51 }
 0x2e6   :  { %v497_v53 = vmul.bf16 %v496_v52, %v496_v52 }
 0x2e8   :  { %v498_v54 = vmul.bf16 %v497_v53, %v496_v52 }
 0x2ea   :  { %v499_v55 = vmul.bf16 1027030327, %v498_v54 }
 0x2ec   :  { %v500_v56 = vadd.bf16 %v499_v55, %v496_v52 }
 0x2ee   :  { %v501_v57 = vmul.bf16 1061961548, %v500_v56 }
 0x2f0   :  { %972 = vtanh.bf16 %v501_v57 }
 0x2fb   :  { %v973_v58 = vpop.eup %972 }
 0x2fc   :  { %v503_v59 = vadd.bf16 1065369472, %v973_v58 }
 0x2fe   :  { %v504_v60 = vmul.bf16 1056980736, %v503_v59 }
 0x300   :  { %v505_v61 = vmul.bf16 %v504_v60, %v496_v52 }
 0x302   :  { %876 = vmatmul.mubr.bf16.vlgmr.msra.gmra.mrb[4].mxu1 %v505_v61 }
 0x3d5   :  { %v604_v9 = vpop.f32.mrb[4].mxu1 }
 0x3d6   :  { %v611_v10 = vpack.c.bf16 %v604_v9, %v604_v9  ;;  %v877_v11 = vpop.f32.mrb[5].mxu1 }
 0x3d7   :  { %v607_v12 = vpop.f32.mrb[6].mxu1 }
 0x3d8   :  { %v613_v13 = vadd.bf16 %v612_v8, %v611_v10  ;;  %v878_v14 = vpop.f32.mrb[7].mxu1 }
 0x3da   :  { %v614_v15 = vmul.bf16 %v613_v13, %v613_v13 }
 0x3dc   :  { %v615_v16 = vmul.bf16 %v614_v15, %v613_v13 }
 0x3de   :  { %v616_v17 = vmul.bf16 1027030327, %v615_v16 }
 0x3e0   :  { %v617_v18 = vadd.bf16 %v616_v17, %v613_v13 }
 0x3e2   :  { %v618_v19 = vmul.bf16 1061961548, %v617_v18 }
 0x3e4   :  { %974 = vtanh.bf16 %v618_v19 }
 0x3ef   :  { %v975_v20 = vpop.eup %974 }
 0x3f0   :  { %v620_v0 = vadd.bf16 1065369472, %v975_v20 }
 0x3f2   :  { %v621_v21 = vmul.bf16 1056980736, %v620_v0 }
 0x3f4   :  { %v622_v22 = vmul.bf16 %v621_v21, %v613_v13 }
 0x3f6   :  { %896 = vmatmul.mubr.bf16.vlgmr.msra.gmra.mrb[8].mxu0 %v622_v22 }
 0x4c9   :  { %v722_v24 = vpop.f32.mrb[8].mxu0 }
 0x4ca   :  { %v723_v25 = vadd.f32 %v722_v24, %v639_v23  ;;  %v897_v26 = vpop.f32.mrb[9].mxu0 }
 0x4cb   :  { %v725_v27 = vpop.f32.mrb[10].mxu0 }
 0x4cc   :  { %728 = vst [vmem:[%s1221_s3] sm:$0xff] %v723_v25  ;;  %v898_v28 = vpop.f32.mrb[11].mxu0 }

</bundles_post_ra>
